<compile_context>
chip_gen: v6e
topology: v6e:2x2x1
jax: 0.10.0
libtpu: 0.0.40
codegen_flags: <defaults>
</compile_context>

<pallas_src>
import functools

import jax
import jax.numpy as jnp
from jax.experimental import pallas as pl
from jax.experimental.pallas import tpu as pltpu

_BN_EPS = 1e-5


def _vmem_limit_bytes():
    try:
        cap = int(pltpu.get_tpu_info().vmem_capacity_bytes)
    except Exception:
        cap = 128 * 1024 * 1024
    # 32 MiB scoped limit on 64 MiB parts (v7x), 64 MiB on 128 MiB parts.
    return max(32 * 1024 * 1024, min(64 * 1024 * 1024, cap // 2))


_VMEM_LIMIT = _vmem_limit_bytes()


# ---------------------------------------------------------------------------
# Flattened-image geometry.
#
# Every per-resolution tensor is kept as a zero padded, row flattened
# (N, L, C) array: the (H+2, W+2) zero-padded image occupies flat rows
# [TM, TM + Hp*Wp) (one full leading slack tile) and the tail is padded so
# that L = nm * TM.  A 3x3 conv then is, for every output row m,
#       out[m] = sum_k  in[m + off_k] @ W_k,  off_k = (dy-1)*Wp + (dx-1),
# evaluated on a (TM + 2P)-row halo window (P = Wp+1) fetched by DMA.
# Tiles 0 and nm-1 only ever hold slack rows, so valid pixels never live
# there; those tiles are skipped and just zeroed.
# ---------------------------------------------------------------------------
def _geometry(H, W, max_ch):
    Wp, Hp = W + 2, H + 2
    P = Wp + 1                                       # max |flat tap offset|
    # halo-conv working set per image row ~= 18 * Wp * C bytes
    # (dbl-buf in + dbl-buf out + f32 acc + K-folded lhs temp)
    budget = (_VMEM_LIMIT * 3) // 4
    th_budget = (budget // (18 * Wp * max(max_ch, 8))) // 8 * 8
    th_full = 8 * (-(-Hp // 8))
    th = max(8, min(th_budget, th_full))
    TM = th * Wp                                     # rows / tile (mult of 8)
    nm = 2 + (-(-Hp // th))                          # +2 slack tiles
    return dict(H=H, W=W, Wp=Wp, Hp=Hp, P=P, th=th, TM=TM, nm=nm,
                L=nm * TM, lead=th + 1, tail=nm * th - th - 1 - H)


def _pad_flatten(x, g):
    """NHWC -> zero padded, row flattened (N, L, C)."""
    n, h, w, c = x.shape
    xp = jnp.pad(x, ((0, 0), (g["lead"], g["tail"]), (1, 1), (0, 0)))
    return xp.reshape(n, g["L"], c)


def _crop(y, g):
    """(N, L, C) flat -> (N, H, W, C)."""
    n, _, c = y.shape
    rows = g["L"] // g["Wp"]
    y = y.reshape(n, rows, g["Wp"], c)
    return y[:, g["lead"]:g["lead"] + g["H"], 1:1 + g["W"], :]


def _interior_mask(g):
    """(L, 1) f32 mask: 1 on valid pixels, 0 on border / slack rows."""
    ones = jnp.ones((1, g["H"], g["W"], 1), jnp.float32)
    return _pad_flatten(ones, g)[0]


def _im2col3x3(x):
    """NHWC -> (N, H, W, 9*C) zero-padded 3x3 patches (tap-major channels)."""
    n, h, w, c = x.shape
    xp = jnp.pad(x, ((0, 0), (1, 1), (1, 1), (0, 0)))
    taps = [xp[:, dy:dy + h, dx:dx + w, :]
            for dy in range(3) for dx in range(3)]
    return jnp.concatenate(taps, axis=-1)


# ----------------------------- Pallas kernels ------------------------------

def _conv3x3_kernel(x_hbm, w_ref, s_ref, b_ref, o_ref, xbuf, sem, *, TM, P, Wp):
    """Fused 3x3 conv + BN + ReLU on one row tile (halo DMA'd from HBM).

    The 3 dx taps for one dy are adjacent flat rows, so they are folded into
    the contraction dimension: per dy one dot with K = 3*cin, three dots total
    accumulating into a single f32 accumulator (no per-tap epilogue math).
    """
    n = pl.program_id(0)
    t = pl.program_id(1)
    nm = pl.num_programs(1)
    win = TM + 2 * P
    slot = jax.lax.rem(t, 2)

    def dma(tt, sl):
        # tt is always in [1, nm-2]  ->  window [tt*TM - P, tt*TM + TM + P)
        # is in-bounds (P <= TM, last compute tile ends at (nm-1)*TM + P <= L).
        return pltpu.make_async_copy(x_hbm.at[n, pl.ds(tt * TM - P, win)],
                                     xbuf.at[sl], sem.at[sl])

    @pl.when(t == 0)                      # slack tile: prime tile 1's DMA
    def _():
        dma(1, 1).start()
        o_ref[...] = jnp.zeros_like(o_ref)

    @pl.when(t == nm - 1)                 # slack tile
    def _():
        o_ref[...] = jnp.zeros_like(o_ref)

    @pl.when((t > 0) & (t < nm - 1))      # compute tiles
    def _():
        @pl.when(t + 1 < nm - 1)          # prefetch next compute tile's halo
        def _():
            dma(t + 1, 1 - slot).start()
        dma(t, slot).wait()

        cout = o_ref.shape[-1]
        acc = jnp.zeros((TM, cout), jnp.float32)
        for dy in range(3):
            lhs = jnp.concatenate(
                [xbuf[slot, pl.ds(dy * Wp + dx, TM), :] for dx in range(3)],
                axis=-1)                                       # (TM, 3*cin)
            acc = acc + jnp.dot(lhs, w_ref[dy],
                                preferred_element_type=jnp.float32)
        y = jnp.maximum(acc * s_ref[...] + b_ref[...], 0.0)
        o_ref[...] = y.astype(o_ref.dtype)


def _pointwise_kernel(x_ref, w_ref, s_ref, b_ref, o_ref):
    """Tiled matmul + BN + ReLU (used for the XLA-im2col'd small-cin convs)."""
    t = pl.program_id(1)
    nm = pl.num_programs(1)

    @pl.when((t > 0) & (t < nm - 1))
    def _():
        y = jnp.dot(x_ref[...], w_ref[...], preferred_element_type=jnp.float32)
        o_ref[...] = jnp.maximum(y * s_ref[...] + b_ref[...],
                                 0.0).astype(o_ref.dtype)

    @pl.when((t == 0) | (t == nm - 1))
    def _():
        o_ref[...] = jnp.zeros_like(o_ref)


def _dual_conv1x1_kernel(x_ref, g_ref, wx_ref, sx_ref, bx_ref,
                         wg_ref, sg_ref, bg_ref, m_ref, xy_ref, sum_ref,
                         *, half):
    """Fused feature/guide 1x1 convs + BN + ReLU, in-VMEM channel concat (by
    writing the two halves directly), border mask and running channel sums for
    the SE average (no HBM concat / extra pass)."""
    t = pl.program_id(1)
    nm = pl.num_programs(1)

    @pl.when(t == 0)
    def _():
        sum_ref[...] = jnp.zeros_like(sum_ref)

    @pl.when((t > 0) & (t < nm - 1))
    def _():
        m = m_ref[...]
        a = jnp.dot(x_ref[...], wx_ref[...], preferred_element_type=jnp.float32)
        a = jnp.maximum(a * sx_ref[...] + bx_ref[...], 0.0) * m
        b = jnp.dot(g_ref[...], wg_ref[...], preferred_element_type=jnp.float32)
        b = jnp.maximum(b * sg_ref[...] + bg_ref[...], 0.0) * m
        xy_ref[:, :half] = a.astype(xy_ref.dtype)
        xy_ref[:, half:] = b.astype(xy_ref.dtype)
        sum_ref[...] += jnp.concatenate(
            [jnp.sum(a, axis=0, keepdims=True),
             jnp.sum(b, axis=0, keepdims=True)], axis=-1)

    @pl.when((t == 0) | (t == nm - 1))
    def _():
        xy_ref[...] = jnp.zeros_like(xy_ref)


def _comb_reduce_kernel(x_ref, d_ref, w1_ref, s1_ref, b1_ref,
                        w2_ref, b2_ref, o_ref):
    """Fused comb 1x1 conv + BN + ReLU, residual add with the block input,
    and final `reduce` 1x1 conv (plain bias, no ReLU)."""
    t = pl.program_id(1)
    nm = pl.num_programs(1)

    @pl.when((t > 0) & (t < nm - 1))
    def _():
        r = jnp.dot(x_ref[...], w1_ref[...], preferred_element_type=jnp.float32)
        r = jnp.maximum(r * s1_ref[...] + b1_ref[...], 0.0)
        r = r + d_ref[...].astype(jnp.float32)
        y = jnp.dot(r.astype(jnp.bfloat16), w2_ref[...],
                    preferred_element_type=jnp.float32) + b2_ref[...]
        # TODO(synk): lane-dense packing of the Cout==1 head (up_3 / final).
        o_ref[...] = y.astype(o_ref.dtype)

    @pl.when((t == 0) | (t == nm - 1))
    def _():
        o_ref[...] = jnp.zeros_like(o_ref)


# ------------------------------- wrappers -----------------------------------

def _compiler_params(sem):
    return pltpu.CompilerParams(dimension_semantics=sem,
                                vmem_limit_bytes=_VMEM_LIMIT)


def conv3x3_halo(x_flat, p, g, se=None):
    """3x3 conv + BN + ReLU on a flat padded (N, L, cin>=16) tensor."""
    n, L, cin = x_flat.shape
    w9 = p["w9"]                                     # (9, cin, cout) bf16
    cout = w9.shape[-1]
    if se is None:
        w = w9.reshape(1, 3, 3 * cin, cout)
        w_map = lambda i, t: (0, 0, 0, 0)
    else:
        # SE gate folded into per-image weights (tiny) instead of activations.
        w = (w9.astype(jnp.float32)[None, :, :, :] * se[:, None, :, None])
        w = w.astype(jnp.bfloat16).reshape(n, 3, 3 * cin, cout)
        w_map = lambda i, t: (i, 0, 0, 0)
    TM, P, nm, Wp = g["TM"], g["P"], g["nm"], g["Wp"]
    win = TM + 2 * P
    kern = functools.partial(_conv3x3_kernel, TM=TM, P=P, Wp=Wp)
    return pl.pallas_call(
        kern,
        out_shape=jax.ShapeDtypeStruct((n, L, cout), jnp.bfloat16),
        grid=(n, nm),
        in_specs=[
            pl.BlockSpec(memory_space=pl.ANY),                     # x in HBM
            pl.BlockSpec((None, 3, 3 * cin, cout), w_map),         # K-folded W
            pl.BlockSpec((1, cout), lambda i, t: (0, 0)),          # bn scale
            pl.BlockSpec((1, cout), lambda i, t: (0, 0)),          # bn bias
        ],
        out_specs=pl.BlockSpec((None, TM, cout), lambda i, t: (i, t, 0)),
        scratch_shapes=[pltpu.VMEM((2, win, cin), jnp.bfloat16),
                        pltpu.SemaphoreType.DMA((2,))],
        compiler_params=_compiler_params(("parallel", "arbitrary")),
    )(x_flat, w, p["scale"], p["bias"])


def conv3x3_small(x_nhwc, p, g):
    """3x3 conv + BN + ReLU for tiny channel counts (RGB / sparse guides,
    1-channel features): XLA im2col to 9*cin lanes + plain matmul kernel."""
    n, _, _, cin = x_nhwc.shape
    cout = p["w9"].shape[-1]
    patches = _pad_flatten(_im2col3x3(x_nhwc.astype(jnp.bfloat16)), g)
    w = p["w9"].reshape(9 * cin, cout)
    TM, nm, L = g["TM"], g["nm"], g["L"]
    return pl.pallas_call(
        _pointwise_kernel,
        out_shape=jax.ShapeDtypeStruct((n, L, cout), jnp.bfloat16),
        grid=(n, nm),
        in_specs=[
            pl.BlockSpec((None, TM, 9 * cin), lambda i, t: (i, t, 0)),
            pl.BlockSpec((9 * cin, cout), lambda i, t: (0, 0)),
            pl.BlockSpec((1, cout), lambda i, t: (0, 0)),
            pl.BlockSpec((1, cout), lambda i, t: (0, 0)),
        ],
        out_specs=pl.BlockSpec((None, TM, cout), lambda i, t: (i, t, 0)),
        compiler_params=_compiler_params(("parallel", "parallel")),
    )(patches, w, p["scale"], p["bias"])


def conv3x3_nhwc(x_nhwc, p, g):
    if x_nhwc.shape[-1] <= 4:
        return conv3x3_small(x_nhwc, p, g)
    return conv3x3_halo(_pad_flatten(x_nhwc, g), p, g)


def dual_conv1x1(x, gd, pf, pg, mask, g):
    n, L, e = x.shape
    eg = gd.shape[-1]
    half = pf["w"].shape[-1]
    c = 2 * half
    TM, nm = g["TM"], g["nm"]
    kern = functools.partial(_dual_conv1x1_kernel, half=half)
    return pl.pallas_call(
        kern,
        out_shape=(jax.ShapeDtypeStruct((n, L, c), jnp.bfloat16),
                   jax.ShapeDtypeStruct((n, 1, c), jnp.float32)),
        grid=(n, nm),
        in_specs=[
            pl.BlockSpec((None, TM, e), lambda i, t: (i, t, 0)),
            pl.BlockSpec((None, TM, eg), lambda i, t: (i, t, 0)),
            pl.BlockSpec((e, half), lambda i, t: (0, 0)),
            pl.BlockSpec((1, half), lambda i, t: (0, 0)),
            pl.BlockSpec((1, half), lambda i, t: (0, 0)),
            pl.BlockSpec((eg, half), lambda i, t: (0, 0)),
            pl.BlockSpec((1, half), lambda i, t: (0, 0)),
            pl.BlockSpec((1, half), lambda i, t: (0, 0)),
            pl.BlockSpec((TM, 1), lambda i, t: (t, 0)),
        ],
        out_specs=(pl.BlockSpec((None, TM, c), lambda i, t: (i, t, 0)),
                   pl.BlockSpec((None, 1, c), lambda i, t: (i, 0, 0))),
        compiler_params=_compiler_params(("parallel", "arbitrary")),
    )(x, gd, pf["w"], pf["scale"], pf["bias"],
      pg["w"], pg["scale"], pg["bias"], mask)


def comb_reduce(x, d, pc, pr, g):
    n, L, e = x.shape
    cin = pc["w"].shape[-1]
    cout = pr["w"].shape[-1]
    TM, nm = g["TM"], g["nm"]
    return pl.pallas_call(
        _comb_reduce_kernel,
        out_shape=jax.ShapeDtypeStruct((n, L, cout), jnp.bfloat16),
        grid=(n, nm),
        in_specs=[
            pl.BlockSpec((None, TM, e), lambda i, t: (i, t, 0)),
            pl.BlockSpec((None, TM, cin), lambda i, t: (i, t, 0)),
            pl.BlockSpec((e, cin), lambda i, t: (0, 0)),
            pl.BlockSpec((1, cin), lambda i, t: (0, 0)),
            pl.BlockSpec((1, cin), lambda i, t: (0, 0)),
            pl.BlockSpec((cin, cout), lambda i, t: (0, 0)),
            pl.BlockSpec((1, cout), lambda i, t: (0, 0)),
        ],
        out_specs=pl.BlockSpec((None, TM, cout), lambda i, t: (i, t, 0)),
        compiler_params=_compiler_params(("parallel", "parallel")),
    )(x, d, pc["w"], pc["scale"], pc["bias"], pr["w"], pr["bias"])


def bilinear(x, scale):
    # TODO(synk): F.interpolate(mode='bilinear', align_corners=False) kept as
    # XLA glue; fusing the resample into the next conv's gather is future work.
    n, h, w, c = x.shape
    nh, nw = int(round(h * scale)), int(round(w * scale))
    return jax.image.resize(x, (n, nh, nw, c), method='bilinear',
                            antialias=False)


def nearest_down(x, factor):
    # F.interpolate default mode='nearest' with scale_factor 1/factor.
    return x[:, ::factor, ::factor, :]


# ----------------------------- parameter setup ------------------------------
# BN folding assumes running_mean=0, running_var=1 (random-init harness);
# real trained stats would need to be folded into scale/bias here.

def _conv3_params(key, cin, cout, bn=True):
    kw, kb = jax.random.split(key)
    w9 = (jax.random.normal(kw, (9, cin, cout), jnp.float32)
          / jnp.sqrt(9.0 * cin)).astype(jnp.bfloat16)
    b = 0.01 * jax.random.normal(kb, (cout,), jnp.float32)
    scale = (jnp.full((cout,), 1.0 / jnp.sqrt(1.0 + _BN_EPS), jnp.float32)
             if bn else jnp.ones((cout,), jnp.float32))
    return {"w9": w9, "scale": scale.reshape(1, cout),
            "bias": (b * scale).reshape(1, cout)}


def _conv1_params(key, cin, cout, bn=True):
    kw, kb = jax.random.split(key)
    w = (jax.random.normal(kw, (cin, cout), jnp.float32)
         / jnp.sqrt(1.0 * cin)).astype(jnp.bfloat16)
    b = 0.01 * jax.random.normal(kb, (cout,), jnp.float32)
    scale = (jnp.full((cout,), 1.0 / jnp.sqrt(1.0 + _BN_EPS), jnp.float32)
             if bn else jnp.ones((cout,), jnp.float32))
    return {"w": w, "scale": scale.reshape(1, cout),
            "bias": (b * scale).reshape(1, cout)}


def make_block_params(key, in_f, expand_f, out_f, guide_f):
    keys = jax.random.split(key, 9)
    half = expand_f // 2
    comb = 2 * half
    return {
        "feat3": _conv3_params(keys[0], in_f, expand_f),
        "feat1": _conv1_params(keys[1], expand_f, half),
        "guide3": _conv3_params(keys[2], guide_f, expand_f),
        "guide1": _conv1_params(keys[3], expand_f, half),
        "se_w1": jax.random.normal(keys[4], (comb, comb), jnp.float32)
                 / jnp.sqrt(1.0 * comb),
        "se_w2": jax.random.normal(keys[5], (comb, comb), jnp.float32)
                 / jnp.sqrt(1.0 * comb),
        "comb3": _conv3_params(keys[6], comb, expand_f),
        "comb1": _conv1_params(keys[7], expand_f, in_f),
        "reduce": _conv1_params(keys[8], in_f, out_f, bn=False),
    }


def block_forward(p, guide, depth):
    """Guided upsampling / depth corrector block (5 fused pallas_calls)."""
    n, h, w, cin = depth.shape
    expand = p["feat3"]["w9"].shape[-1]
    out_f = p["reduce"]["w"].shape[-1]
    g = _geometry(h, w, max(cin, expand, out_f))

    d_flat = _pad_flatten(depth, g)          # residual input for comb_reduce
    mask = _interior_mask(g)

    x = (conv3x3_halo(d_flat, p["feat3"], g) if cin > 4
         else conv3x3_small(depth, p["feat3"], g))      # feature branch
    y = conv3x3_nhwc(guide, p["guide3"], g)             # guidance branch
    xy, sums = dual_conv1x1(x, y, p["feat1"], p["guide1"], mask, g)

    # SE attention: fc math on tiny (N, C) vectors stays in XLA; the channel
    # gate is folded into the comb3 weights per image (not per-pixel math).
    mean = sums[:, 0, :] / float(h * w)
    se = jax.nn.sigmoid(jnp.maximum(mean @ p["se_w1"], 0.0) @ p["se_w2"])

    r = conv3x3_halo(xy, p["comb3"], g, se=se)
    out = comb_reduce(r, d_flat, p["comb1"], p["reduce"], g)
    return _crop(out, g)


def make_backbone_params(key, features=64):
    k = jax.random.split(key, 3)
    return [_conv3_params(k[0], 3, 32),
            _conv3_params(k[1], 32, features),
            _conv3_params(k[2], features, features)]


def backbone_forward(params, rgb):
    # TODO(synk): DualResNet_Backbone (pretrained DDRNet-23-slim) approximated
    # by three stride-2 conv3x3+BN+ReLU stages -> 1/8 resolution features.
    # TODO(synk): fold the stride-2 subsample into the conv kernel's output
    # index_map instead of computing the full-resolution map and slicing.
    y = rgb
    for p in params:
        n, h, w, c = y.shape
        cout = p["w9"].shape[-1]
        g = _geometry(h, w, max(c, cout))
        y = _crop(conv3x3_nhwc(y, p, g), g)
        y = y[:, ::2, ::2, :]
    return y


# -------------------------------- model -------------------------------------

class AuxSparseGuidedDepthPallas:
    def __init__(self, key, up_features=(64, 32, 16), inner_features=(64, 32, 16)):
        ks = jax.random.split(key, 9)
        self.backbone = make_backbone_params(ks[0], up_features[0])
        self.up_1 = make_block_params(ks[1], up_features[0], inner_features[0],
                                      up_features[1], guide_f=3)
        self.up_2 = make_block_params(ks[2], up_features[1], inner_features[1],
                                      up_features[2], guide_f=3)
        self.up_3 = make_block_params(ks[3], up_features[2], inner_features[2],
                                      1, guide_f=3)
        # TODO(synk): DepthCorrector assumed structurally identical to the
        # guided upsampling block but with a 1-channel (sparse depth) guide.
        self.ref_down_1 = make_block_params(ks[4], 1, inner_features[2],
                                            up_features[1], guide_f=1)
        self.ref_down_2 = make_block_params(ks[5], up_features[1],
                                            inner_features[1], up_features[0],
                                            guide_f=1)
        self.ref_up_2 = make_block_params(ks[6], up_features[0],
                                          inner_features[0], up_features[1],
                                          guide_f=1)
        self.ref_up_1 = make_block_params(ks[7], up_features[1],
                                          inner_features[1], up_features[2],
                                          guide_f=1)
        self.final = make_block_params(ks[8], up_features[2],
                                       inner_features[2], 1, guide_f=1)

    def __call__(self, rgb_nchw, sparse_nchw):
        rgb = jnp.transpose(rgb_nchw, (0, 2, 3, 1)).astype(jnp.bfloat16)
        sparse = jnp.transpose(sparse_nchw, (0, 2, 3, 1)).astype(jnp.bfloat16)

        y = backbone_forward(self.backbone, rgb)
        x_half = nearest_down(rgb, 2)
        x_quarter = nearest_down(rgb, 4)

        y = bilinear(y, 2.0)
        y = block_forward(self.up_1, x_quarter, y)
        y = bilinear(y, 2.0)
        y = block_forward(self.up_2, x_half, y)
        y = bilinear(y, 2.0)
        y = block_forward(self.up_3, rgb, y)

        sparse_half = nearest_down(sparse, 2)
        sparse_quarter = nearest_down(sparse, 4)

        y = block_forward(self.ref_down_1, sparse, y)
        y = bilinear(y, 0.5)
        y = block_forward(self.ref_down_2, sparse_half, y)
        y = bilinear(y, 0.5)
        y = block_forward(self.ref_up_2, sparse_quarter, y)
        y = bilinear(y, 2.0)
        y = block_forward(self.ref_up_1, sparse_half, y)
        y = bilinear(y, 2.0)
        y = block_forward(self.final, sparse, y)
        return jnp.transpose(y, (0, 3, 1, 2)).astype(jnp.float32)


# --------------------------------- main --------------------------------------

if __name__ == "__main__":
    key = jax.random.PRNGKey(0)
    kp, kr, ks = jax.random.split(key, 3)
    model = AuxSparseGuidedDepthPallas(kp)
    rgb = jax.random.normal(kr, (2, 3, 16, 16), jnp.float32)
    sparse = jax.random.normal(ks, (2, 1, 16, 16), jnp.float32)
    out = model(rgb, sparse)
    jax.block_until_ready(out)
    assert out.shape == (2, 1, 16, 16), out.shape
    print("KERNEL_OK")
</pallas_src>

<mosaic_0001>
module attributes {stable_mosaic.version = 11 : i64} {
  func.func @_pointwise_kernel(%arg0: i32, %arg1: i32, %arg2: memref<1x432x27xbf16, #tpu.memory_space<vmem>>, %arg3: memref<27x32xbf16, #tpu.memory_space<vmem>>, %arg4: memref<1x32xf32, #tpu.memory_space<vmem>>, %arg5: memref<1x32xf32, #tpu.memory_space<vmem>>, %arg6: memref<1x432x32xbf16, #tpu.memory_space<vmem>>) attributes {dimension_semantics = [#tpu.dimension_semantics<parallel>, #tpu.dimension_semantics<parallel>], iteration_bounds = array<i64: 2, 3>, scalar_prefetch = 0 : i64, scratch_operands = 0 : i64, tpu.core_type = #tpu.core_type<tc>, window_params = [{transform_indices = @transform_0, window_bounds = array<i64: 1, 432, 27>}, {pipeline_mode = #tpu.pipeline_mode<synchronous>, transform_indices = @transform_1, window_bounds = array<i64: 27, 32>}, {pipeline_mode = #tpu.pipeline_mode<synchronous>, transform_indices = @transform_2, window_bounds = array<i64: 1, 32>}, {pipeline_mode = #tpu.pipeline_mode<synchronous>, transform_indices = @transform_3, window_bounds = array<i64: 1, 32>}, {transform_indices = @transform_4, window_bounds = array<i64: 1, 432, 32>}]} {
    %c0_i32 = arith.constant 0 : i32
    %0 = arith.cmpi sgt, %arg1, %c0_i32 : i32
    %c2_i32 = arith.constant 2 : i32
    %1 = arith.cmpi slt, %arg1, %c2_i32 : i32
    %2 = arith.andi %0, %1 : i1
    %3 = arith.extui %2 : i1 to i32
    %c0_i32_0 = arith.constant 0 : i32
    %4 = arith.cmpi ne, %3, %c0_i32_0 : i32
    scf.if %4 {
      %c0 = arith.constant 0 : index
      %c0_4 = arith.constant 0 : index
      %c0_5 = arith.constant 0 : index
      %10 = vector.load %arg2[%c0, %c0_4, %c0_5] : memref<1x432x27xbf16, #tpu.memory_space<vmem>>, vector<1x432x27xbf16>
      %11 = vector.shape_cast %10 : vector<1x432x27xbf16> to vector<432x27xbf16>
      %c0_6 = arith.constant 0 : index
      %c0_7 = arith.constant 0 : index
      %12 = vector.load %arg3[%c0_6, %c0_7] : memref<27x32xbf16, #tpu.memory_space<vmem>>, vector<27x32xbf16>
      %cst = arith.constant dense<0.000000e+00> : vector<432x32xf32>
      %13 = tpu.matmul %11, %12, %cst {dimension_numbers = #tpu.dot_dimension_numbers<[1], [0], [0], [1], [0, 0, 1, 1], [], []>} : vector<432x27xbf16>, vector<27x32xbf16>, vector<432x32xf32> -> vector<432x32xf32>
      %c0_8 = arith.constant 0 : index
      %c0_9 = arith.constant 0 : index
      %14 = vector.load %arg4[%c0_8, %c0_9] : memref<1x32xf32, #tpu.memory_space<vmem>>, vector<1x32xf32>
      %15 = vector.broadcast %14 : vector<1x32xf32> to vector<432x32xf32>
      %16 = arith.mulf %13, %15 : vector<432x32xf32>
      %c0_10 = arith.constant 0 : index
      %c0_11 = arith.constant 0 : index
      %17 = vector.load %arg5[%c0_10, %c0_11] : memref<1x32xf32, #tpu.memory_space<vmem>>, vector<1x32xf32>
      %18 = vector.broadcast %17 : vector<1x32xf32> to vector<432x32xf32>
      %19 = arith.addf %16, %18 : vector<432x32xf32>
      %cst_12 = arith.constant 0.000000e+00 : f32
      %20 = vector.broadcast %cst_12 : f32 to vector<432x32xf32>
      %21 = arith.maximumf %19, %20 : vector<432x32xf32>
      %22 = arith.truncf %21 : vector<432x32xf32> to vector<432x32xbf16>
      %c0_13 = arith.constant 0 : index
      %c0_14 = arith.constant 0 : index
      %c0_15 = arith.constant 0 : index
      %23 = vector.load %arg6[%c0_13, %c0_14, %c0_15] : memref<1x432x32xbf16, #tpu.memory_space<vmem>>, vector<1x432x32xbf16>
      %24 = vector.shape_cast %23 : vector<1x432x32xbf16> to vector<432x32xbf16>
      %25 = vector.shape_cast %22 : vector<432x32xbf16> to vector<1x432x32xbf16>
      tpu.vector_store %arg6[%c0_13, %c0_14, %c0_15], %25 {strides = array<i32>} : memref<1x432x32xbf16, #tpu.memory_space<vmem>>, vector<1x432x32xbf16>,
    } else {
    }
    %c0_i32_1 = arith.constant 0 : i32
    %5 = arith.cmpi eq, %arg1, %c0_i32_1 : i32
    %c2_i32_2 = arith.constant 2 : i32
    %6 = arith.cmpi eq, %arg1, %c2_i32_2 : i32
    %7 = arith.ori %5, %6 : i1
    %8 = arith.extui %7 : i1 to i32
    %c0_i32_3 = arith.constant 0 : i32
    %9 = arith.cmpi ne, %8, %c0_i32_3 : i32
    scf.if %9 {
      %cst = arith.constant 0.000000e+00 : bf16
      %10 = vector.broadcast %cst : bf16 to vector<432x32xbf16>
      %c0 = arith.constant 0 : index
      %c0_4 = arith.constant 0 : index
      %c0_5 = arith.constant 0 : index
      %11 = vector.load %arg6[%c0, %c0_4, %c0_5] : memref<1x432x32xbf16, #tpu.memory_space<vmem>>, vector<1x432x32xbf16>
      %12 = vector.shape_cast %11 : vector<1x432x32xbf16> to vector<432x32xbf16>
      %13 = vector.shape_cast %10 : vector<432x32xbf16> to vector<1x432x32xbf16>
      tpu.vector_store %arg6[%c0, %c0_4, %c0_5], %13 {strides = array<i32>} : memref<1x432x32xbf16, #tpu.memory_space<vmem>>, vector<1x432x32xbf16>,
    } else {
    }
    return
  }
  func.func @transform_0(%arg0: i32, %arg1: i32) -> (i32, i32, i32) {
    %c0_i32 = arith.constant 0 : i32
    %c0_i32_0 = arith.constant 0 : i32
    return %arg0, %arg1, %c0_i32 : i32, i32, i32
  }
  func.func @transform_1(%arg0: i32, %arg1: i32) -> (i32, i32) {
    %c0_i32 = arith.constant 0 : i32
    %c0_i32_0 = arith.constant 0 : i32
    %c0_i32_1 = arith.constant 0 : i32
    return %c0_i32, %c0_i32_0 : i32, i32
  }
  func.func @transform_2(%arg0: i32, %arg1: i32) -> (i32, i32) {
    %c0_i32 = arith.constant 0 : i32
    %c0_i32_0 = arith.constant 0 : i32
    %c0_i32_1 = arith.constant 0 : i32
    return %c0_i32, %c0_i32_0 : i32, i32
  }
  func.func @transform_3(%arg0: i32, %arg1: i32) -> (i32, i32) {
    %c0_i32 = arith.constant 0 : i32
    %c0_i32_0 = arith.constant 0 : i32
    %c0_i32_1 = arith.constant 0 : i32
    return %c0_i32, %c0_i32_0 : i32, i32
  }
  func.func @transform_4(%arg0: i32, %arg1: i32) -> (i32, i32, i32) {
    %c0_i32 = arith.constant 0 : i32
    %c0_i32_0 = arith.constant 0 : i32
    return %arg0, %arg1, %c0_i32 : i32, i32, i32
  }
}

</mosaic_0001>

<bundles_post_ra>
// kernel: tpu_custom_call.1
= control target key start
LH: loop header
LB: loop body
LE: loop exit
PB: predicated region body
PF: predicated region fallthrough
CT: control target
= control target key end

     0   :  { %s1847_s15 = smov 0   ;;  %s1849_s16 = smov 0   ;;  %s2361_s0 = inlined_call_operand.vmem [shape: bf16[2,1296,27], index: 0, kind: input, shape index: {}]   ;;  %s2362_s1 = inlined_call_operand.vmem [shape: bf16[27,32], index: 1, kind: input, shape index: {}]   ;;  %s2363_s2 = inlined_call_operand.vmem [shape: f32[1,32], index: 2, kind: input, shape index: {}]   ;;  %s2364_s3 = inlined_call_operand.vmem [shape: f32[1,32], index: 3, kind: input, shape index: {}]   ;;  %s2365_s4 = inlined_call_operand.vmem [shape: bf16[2,1296,32], index: 4, kind: output, shape index: {}]  }
   0x1   :  { %s1851_s17 = smov 0   ;;  %s1853_s18 = smov 0  }
   0x2   :  { %s1855_s19 = smov 0  }
   0x3 LB: > { %s23_s20 = sadd.s32 1, %s1808_s17  ;;  %s26_s21 = sadd.s32 1, %s1812_s18  ;;  %s1816_s19 = sphi %s1855_s19, %s14_s19   ;;  %s1812_s18 = sphi %s1853_s18, %s2369_s18   ;;  %s1808_s17 = sphi %s1851_s17, %s2368_s17   ;;  %s1804_s16 = sphi %s1849_s16, %s2367_s16   ;;  %s1800_s15 = sphi %s1847_s15, %s2366_s15  }
   0x4   : > { %p24_p0 = scmp.ge.s32.totalorder %s23_s20, 3  ;;  %p1388_p1 = scmp.ge.s32.totalorder %s1816_s19, 1 }
   0x5   : > { %p183_p2 = scmp.lt.s32.totalorder %s1816_s19, 7 }
   0x6   : > { %s2371_s20 = smov (%p24_p0, %s23_s20), 0  ;;  %s2373_s21 = smov (!%p24_p0, %s26_s21), %s1812_s18 }
   0x7   : > { %p184_p3 = pnand %p1388_p1, %p183_p2  ;;  %p28_p4 = scmp.ge.s32.totalorder %s2373_s21, 2 }
   0x8   : > { %s217_s22 = smul.u32 (!%p184_p3), 54, %s1800_s15  ;;  %p218_p5 = scmp.lt.s32.totalorder (!%p184_p3), %s1804_s16, 1 }
   0x9   : > { %s2375_s21 = smov (%p28_p4, %s2373_s21), 0  ;;  %187 = sbr.rel (%p184_p3) target bundleno = 374 (0x176), region = 36 }
   0xa   : > { %p238_p6 = scmp.gt.s32.totalorder (!%p184_p3), %s1800_s15, 0  ;;  %p239_p7 = scmp.lt.s32.totalorder (!%p184_p3), %s1800_s15, 2 }
   0xb   : > { %p220_p8 = scmp.lt.s32.totalorder (!%p184_p3), %s217_s22, 161 }
   0xc   : > { %p240_p9 = pnand (!%p184_p3), %p239_p7, %p238_p6 }
   0xe   : > { %s2377_s16 = smov (!%p218_p5, %s1804_s16), 1  ;;  %s2379_s22 = smov (!%p220_p8, %s217_s22), 161 }
   0xf   : > { %s1704_s23 = smul.u32 162, %s2377_s16 }
  0x10   : > { %243 = sbr.rel (%p240_p9) target bundleno = 343 (0x157), region = 40 }
  0x11   : > { %s223_s24 = sadd.s32 %s1704_s23, %s2379_s22 }
  0x12   : > { %s1389_s25 = sshll.u32 %s223_s24, 2 }
  0x13   : > { %s1885_s28 = scalar_lea.vmem %s2361_s0, %s1389_s25  ;;  %s1890_s5 = scalar_lea.vmem %s2365_s4, %s1389_s25 }
  0x15   : > { %vm530_vm0 = vcmask 1044480   ;;  %v1818_v0 = vmov 0.0   ;;  %v1749_v1 = vld [vmem:[%s2362_s1 + $0x8] sm:$0x3f]   ;;  %vm531_vm1 = vcmask 1045504   ;;  %v1819_v2 = vmov 65535  }
  0x16   : > { %1588 = vmatprep.subr.bf16.mxu0 %v1818_v0  ;;  %1700 = vmatprep.subr.bf16.mxu1 %v1818_v0  ;;  %v532_v3 = vsel %vm530_vm0, 4294967295, %v1819_v2  ;;  %vm1820_vm2 = vmmov 0   ;;  %v1750_v6 = vld [vmem:[%s2362_s1] sm:$0xff]   ;;  %v1752_v8 = vld [vmem:[%s1885_s28 + $0x70] sm:$0xff]   ;;  %vm448_vm3 = vcmask 220160   ;;  %v1753_v9 = vld [vmem:[%s1885_s28 + $0x8] sm:$0xff]  }
  0x17   : > { %v533_v4 = vsel %vm531_vm1, %v532_v3, 0  ;;  %1592 = vmatprep.mubr.msk.bf16.mxu0 %vm1820_vm2, %v1818_v0  ;;  %1648 = vmatprep.mubr.msk.bf16.mxu1 %vm1820_vm2, %v1818_v0  ;;  %v1751_v7 = vld [vmem:[%s1885_s28] sm:$0xff]   ;;  %v1754_v10 = vld [vmem:[%s1885_s28 + $0x78] sm:$0xff]   ;;  %v1755_v11 = vld [vmem:[%s1885_s28 + $0x10] sm:$0xff]   ;;  %vm1178_vm4 = vcmask 257024  }
  0x18   : > { %v535_v5 = vand.u32 %v1749_v1, %v533_v4  ;;  %v1756_v12 = vld [vmem:[%s1885_s28 + $0x80] sm:$0xff]   ;;  %v1757_v13 = vld [vmem:[%s1885_s28 + $0x18] sm:$0xff]   ;;  %v1758_v14 = vld [vmem:[%s1885_s28 + $0x88] sm:$0xff]  }
  0x19   : > { %v1759_v15 = vld [vmem:[%s1885_s28 + $0x20] sm:$0xff]   ;;  %v1760_v16 = vld [vmem:[%s1885_s28 + $0x90] sm:$0xff]   ;;  %v1761_v17 = vld [vmem:[%s1885_s28 + $0x28] sm:$0xff]  }
  0x1a   : > { %1589 = vmatpush3.bf16.msra.mxu0 %v535_v5  ;;  %1702 = vmatpush3.bf16.msra.mxu1 %v535_v5  ;;  %v1762_v18 = vld [vmem:[%s1885_s28 + $0x98] sm:$0xff]   ;;  %v1763_v19 = vld [vmem:[%s1885_s28 + $0x30] sm:$0xff]   ;;  %v1764_v20 = vld [vmem:[%s1885_s28 + $0xa0] sm:$0xff]  }
  0x1b   : > { %1590 = vmatprep.subr.bf16.mxu0 %v1818_v0  ;;  %1701 = vmatprep.subr.bf16.mxu1 %v1818_v0  ;;  %v1765_v21 = vld [vmem:[%s1885_s28 + $0x38] sm:$0xff]   ;;  %v1766_v22 = vld [vmem:[%s1885_s28 + $0xa8] sm:$0xff]   ;;  %v1767_v23 = vld [vmem:[%s1885_s28 + $0x40] sm:$0xff]  }
  0x1c   : > { %v1768_v24 = vld [vmem:[%s1885_s28 + $0xb0] sm:$0xff]   ;;  %v1769_v25 = vld [vmem:[%s1885_s28 + $0x48] sm:$0xff]   ;;  %v1770_v26 = vld [vmem:[%s1885_s28 + $0xb8] sm:$0xff]  }
  0x1d   : > { %v1771_v27 = vld [vmem:[%s1885_s28 + $0x50] sm:$0xff]   ;;  %v1772_v28 = vld [vmem:[%s1885_s28 + $0xc0] sm:$0xff]   ;;  %v1773_v29 = vld [vmem:[%s1885_s28 + $0x58] sm:$0xff]  }
  0x1e   : > { %1591 = vmatpush3.bf16.msra.mxu0 %v1750_v6  ;;  %1703 = vmatpush3.bf16.msra.mxu1 %v1750_v6  ;;  %v1774_v30 = vld [vmem:[%s1885_s28 + $0xc8] sm:$0xff]   ;;  %v1775_v31 = vld [vmem:[%s1885_s28 + $0x60] sm:$0xff]   ;;  %v1776_v32 = vld [vmem:[%s1885_s28 + $0xd0] sm:$0xff]  }
  0x1f   : > { %v1777_v33 = vld [vmem:[%s1885_s28 + $0x68] sm:$0xff]   ;;  %v2013_v34 = vld [vmem:[%s2363_s2] ss:$0 sm:$0xff] }
  0x20   : > { %v2018_v36 = vld [vmem:[%s2364_s3] ss:$0 sm:$0xff] }
  0x21   : > { %1593 = vmatmul.mubr.msk.bf16.vlgmr.msra.gmra.mxu0 %vm448_vm3, %v1751_v7  ;;  %1649 = vmatmul.mubr.msk.bf16.vlgmr.msra.gmra.mxu1 %vm448_vm3, %v1752_v8 }
  0x22   : > { %1596 = vmatprep.mubr.msk.bf16.mxu0 %vm1820_vm2, %v1818_v0  ;;  %1652 = vmatprep.mubr.msk.bf16.mxu1 %vm1820_vm2, %v1818_v0 }
  0x29   : > { %1597 = vmatmul.mubr.msk.bf16.gmra.mxu0 %vm448_vm3, %v1753_v9  ;;  %1653 = vmatmul.mubr.msk.bf16.gmra.mxu1 %vm448_vm3, %v1754_v10 }
  0x2a   : > { %1600 = vmatprep.mubr.msk.bf16.mxu0 %vm1820_vm2, %v1818_v0  ;;  %1656 = vmatprep.mubr.msk.bf16.mxu1 %vm1820_vm2, %v1818_v0 }
  0x31   : > { %1601 = vmatmul.mubr.msk.bf16.gmra.mxu0 %vm448_vm3, %v1755_v11  ;;  %1657 = vmatmul.mubr.msk.bf16.gmra.mxu1 %vm448_vm3, %v1756_v12 }
  0x32   : > { %1604 = vmatprep.mubr.msk.bf16.mxu0 %vm1820_vm2, %v1818_v0  ;;  %1660 = vmatprep.mubr.msk.bf16.mxu1 %vm1820_vm2, %v1818_v0 }
  0x39   : > { %1605 = vmatmul.mubr.msk.bf16.gmra.mxu0 %vm448_vm3, %v1757_v13  ;;  %1661 = vmatmul.mubr.msk.bf16.gmra.mxu1 %vm448_vm3, %v1758_v14 }
  0x3a   : > { %1608 = vmatprep.mubr.msk.bf16.mxu0 %vm1820_vm2, %v1818_v0  ;;  %1664 = vmatprep.mubr.msk.bf16.mxu1 %vm1820_vm2, %v1818_v0 }
  0x41   : > { %1609 = vmatmul.mubr.msk.bf16.gmra.mxu0 %vm448_vm3, %v1759_v15  ;;  %1665 = vmatmul.mubr.msk.bf16.gmra.mxu1 %vm448_vm3, %v1760_v16 }
  0x42   : > { %1612 = vmatprep.mubr.msk.bf16.mxu0 %vm1820_vm2, %v1818_v0  ;;  %1668 = vmatprep.mubr.msk.bf16.mxu1 %vm1820_vm2, %v1818_v0 }
  0x49   : > { %1613 = vmatmul.mubr.msk.bf16.gmra.mxu0 %vm448_vm3, %v1761_v17  ;;  %1669 = vmatmul.mubr.msk.bf16.gmra.mxu1 %vm448_vm3, %v1762_v18 }
  0x4a   : > { %1616 = vmatprep.mubr.msk.bf16.mxu0 %vm1820_vm2, %v1818_v0  ;;  %1672 = vmatprep.mubr.msk.bf16.mxu1 %vm1820_vm2, %v1818_v0 }
  0x51   : > { %1617 = vmatmul.mubr.msk.bf16.gmra.mxu0 %vm448_vm3, %v1763_v19  ;;  %1673 = vmatmul.mubr.msk.bf16.gmra.mxu1 %vm448_vm3, %v1764_v20 }
  0x52   : > { %1620 = vmatprep.mubr.msk.bf16.mxu0 %vm1820_vm2, %v1818_v0  ;;  %1676 = vmatprep.mubr.msk.bf16.mxu1 %vm1820_vm2, %v1818_v0 }
  0x59   : > { %1621 = vmatmul.mubr.msk.bf16.gmra.mxu0 %vm448_vm3, %v1765_v21  ;;  %1677 = vmatmul.mubr.msk.bf16.gmra.mxu1 %vm448_vm3, %v1766_v22 }
  0x5a   : > { %1624 = vmatprep.mubr.msk.bf16.mxu0 %vm1820_vm2, %v1818_v0  ;;  %1680 = vmatprep.mubr.msk.bf16.mxu1 %vm1820_vm2, %v1818_v0 }
  0x61   : > { %1625 = vmatmul.mubr.msk.bf16.gmra.mxu0 %vm448_vm3, %v1767_v23  ;;  %1681 = vmatmul.mubr.msk.bf16.gmra.mxu1 %vm448_vm3, %v1768_v24 }
  0x62   : > { %1628 = vmatprep.mubr.msk.bf16.mxu0 %vm1820_vm2, %v1818_v0  ;;  %1684 = vmatprep.mubr.msk.bf16.mxu1 %vm1820_vm2, %v1818_v0 }
  0x69   : > { %1629 = vmatmul.mubr.msk.bf16.gmra.mxu0 %vm448_vm3, %v1769_v25  ;;  %1685 = vmatmul.mubr.msk.bf16.gmra.mxu1 %vm448_vm3, %v1770_v26 }
  0x6a   : > { %1632 = vmatprep.mubr.msk.bf16.mxu0 %vm1820_vm2, %v1818_v0  ;;  %1688 = vmatprep.mubr.msk.bf16.mxu1 %vm1820_vm2, %v1818_v0 }
  0x71   : > { %1633 = vmatmul.mubr.msk.bf16.gmra.mxu0 %vm448_vm3, %v1771_v27  ;;  %1689 = vmatmul.mubr.msk.bf16.gmra.mxu1 %vm448_vm3, %v1772_v28 }
  0x72   : > { %1636 = vmatprep.mubr.msk.bf16.mxu0 %vm1820_vm2, %v1818_v0  ;;  %1692 = vmatprep.mubr.msk.bf16.mxu1 %vm1820_vm2, %v1818_v0 }
  0x79   : > { %1637 = vmatmul.mubr.msk.bf16.gmra.mxu0 %vm448_vm3, %v1773_v29  ;;  %1693 = vmatmul.mubr.msk.bf16.gmra.mxu1 %vm448_vm3, %v1774_v30 }
  0x7a   : > { %1640 = vmatprep.mubr.msk.bf16.mxu0 %vm1820_vm2, %v1818_v0  ;;  %1696 = vmatprep.mubr.msk.bf16.mxu1 %vm1820_vm2, %v1818_v0 }
  0x81   : > { %1641 = vmatmul.mubr.msk.bf16.gmra.mxu0 %vm448_vm3, %v1775_v31  ;;  %1697 = vmatmul.mubr.msk.bf16.gmra.mxu1 %vm448_vm3, %v1776_v32 }
  0x82   : > { %1644 = vmatprep.mubr.msk.bf16.mxu0 %vm1820_vm2, %v1818_v0 }
  0x89   : > { %1645 = vmatmul.mubr.msk.bf16.gmra.mxu0 %vm448_vm3, %v1777_v33 }
  0xe1   : > { %v571_v35 = vpop.f32.mrf.mxu0  ;;  %v683_v37 = vpop.f32.mrf.mxu1 }
  0xe2   : > { %v793_v38 = vmul.f32 %v2013_v34, %v571_v35  ;;  %v821_v39 = vmul.f32 %v2013_v34, %v683_v37 }
  0xe3   : > { %v1594_v40 = vpop.f32.mrf.mxu0  ;;  %v1650_v41 = vpop.f32.mrf.mxu1 }
  0xe4   : > { %v854_v42 = vadd.f32 %v2018_v36, %v793_v38  ;;  %v882_v43 = vadd.f32 %v2018_v36, %v821_v39 }
  0xe5   : > { %v574_v44 = vpop.f32.mrf.mxu0  ;;  %v686_v45 = vpop.f32.mrf.mxu1 }
  0xe6   : > { %v908_v46 = vmax.f32 %v854_v42, 0.0  ;;  %v936_v47 = vmax.f32 %v882_v43, 0.0  ;;  %v794_v48 = vmul.f32 %v2013_v34, %v574_v44  ;;  %v822_v49 = vmul.f32 %v2013_v34, %v686_v45 }
  0xe7   : > { %v1595_v50 = vpop.f32.mrf.mxu0  ;;  %v1651_v51 = vpop.f32.mrf.mxu1 }
  0xe8   : > { %v1505_v52 = vpack.c.bf16 %v908_v46, %v908_v46  ;;  %v1533_v53 = vpack.c.bf16 %v936_v47, %v936_v47  ;;  %v855_v54 = vadd.f32 %v2018_v36, %v794_v48  ;;  %v883_v55 = vadd.f32 %v2018_v36, %v822_v49 }
  0xe9   : > { %v579_v56 = vpop.f32.mrf.mxu0  ;;  %v691_v57 = vpop.f32.mrf.mxu1 }
  0xea   : > { %1179 = vst.msk [vmem:[%s1890_s5] sm:$0xf] %vm1178_vm4, %v1505_v52  ;;  %1207 = vst.msk [vmem:[%s1890_s5 + $0x70] sm:$0xf] %vm1178_vm4, %v1533_v53  ;;  %v909_v58 = vmax.f32 %v855_v54, 0.0  ;;  %v937_v59 = vmax.f32 %v883_v55, 0.0  ;;  %v795_v60 = vmul.f32 %v2013_v34, %v579_v56  ;;  %v823_v61 = vmul.f32 %v2013_v34, %v691_v57 }
  0xeb   : > { %v1598_v62 = vpop.f32.mrf.mxu0  ;;  %v1654_v63 = vpop.f32.mrf.mxu1 }
  0xec   : > { %v1506_v0 = vpack.c.bf16 %v909_v58, %v909_v58  ;;  %v1534_v1 = vpack.c.bf16 %v937_v59, %v937_v59  ;;  %v856_v2 = vadd.f32 %v2018_v36, %v795_v60  ;;  %v884_v3 = vadd.f32 %v2018_v36, %v823_v61 }
  0xed   : > { %v582_v4 = vpop.f32.mrf.mxu0  ;;  %v694_v5 = vpop.f32.mrf.mxu1 }
  0xee   : > { %1180 = vst.msk [vmem:[%s1890_s5 + $0x4] sm:$0xf] %vm1178_vm4, %v1506_v0  ;;  %1208 = vst.msk [vmem:[%s1890_s5 + $0x74] sm:$0xf] %vm1178_vm4, %v1534_v1  ;;  %v910_v6 = vmax.f32 %v856_v2, 0.0  ;;  %v938_v7 = vmax.f32 %v884_v3, 0.0  ;;  %v796_v8 = vmul.f32 %v2013_v34, %v582_v4  ;;  %v824_v9 = vmul.f32 %v2013_v34, %v694_v5 }
  0xef   : > { %v1599_v10 = vpop.f32.mrf.mxu0  ;;  %v1655_v11 = vpop.f32.mrf.mxu1 }
  0xf0   : > { %v1507_v12 = vpack.c.bf16 %v910_v6, %v910_v6  ;;  %v1535_v13 = vpack.c.bf16 %v938_v7, %v938_v7  ;;  %v857_v14 = vadd.f32 %v2018_v36, %v796_v8  ;;  %v885_v15 = vadd.f32 %v2018_v36, %v824_v9 }
  0xf1   : > { %v587_v16 = vpop.f32.mrf.mxu0  ;;  %v699_v17 = vpop.f32.mrf.mxu1 }
  0xf2   : > { %1181 = vst.msk [vmem:[%s1890_s5 + $0x8] sm:$0xf] %vm1178_vm4, %v1507_v12  ;;  %1209 = vst.msk [vmem:[%s1890_s5 + $0x78] sm:$0xf] %vm1178_vm4, %v1535_v13  ;;  %v911_v18 = vmax.f32 %v857_v14, 0.0  ;;  %v939_v19 = vmax.f32 %v885_v15, 0.0  ;;  %v797_v20 = vmul.f32 %v2013_v34, %v587_v16  ;;  %v825_v21 = vmul.f32 %v2013_v34, %v699_v17 }
  0xf3   : > { %v1602_v22 = vpop.f32.mrf.mxu0  ;;  %v1658_v23 = vpop.f32.mrf.mxu1 }
  0xf4   : > { %v1508_v24 = vpack.c.bf16 %v911_v18, %v911_v18  ;;  %v1536_v25 = vpack.c.bf16 %v939_v19, %v939_v19  ;;  %v858_v26 = vadd.f32 %v2018_v36, %v797_v20  ;;  %v886_v27 = vadd.f32 %v2018_v36, %v825_v21 }
  0xf5   : > { %v590_v28 = vpop.f32.mrf.mxu0  ;;  %v702_v29 = vpop.f32.mrf.mxu1 }
  0xf6   : > { %1182 = vst.msk [vmem:[%s1890_s5 + $0xc] sm:$0xf] %vm1178_vm4, %v1508_v24  ;;  %1210 = vst.msk [vmem:[%s1890_s5 + $0x7c] sm:$0xf] %vm1178_vm4, %v1536_v25  ;;  %v912_v30 = vmax.f32 %v858_v26, 0.0  ;;  %v940_v31 = vmax.f32 %v886_v27, 0.0  ;;  %v798_v32 = vmul.f32 %v2013_v34, %v590_v28  ;;  %v826_v33 = vmul.f32 %v2013_v34, %v702_v29 }
  0xf7   : > { %v1603_v35 = vpop.f32.mrf.mxu0  ;;  %v1659_v37 = vpop.f32.mrf.mxu1 }
  0xf8   : > { %v1509_v38 = vpack.c.bf16 %v912_v30, %v912_v30  ;;  %v1537_v39 = vpack.c.bf16 %v940_v31, %v940_v31  ;;  %v859_v40 = vadd.f32 %v2018_v36, %v798_v32  ;;  %v887_v41 = vadd.f32 %v2018_v36, %v826_v33 }
  0xf9   : > { %v595_v42 = vpop.f32.mrf.mxu0  ;;  %v707_v43 = vpop.f32.mrf.mxu1 }
  0xfa   : > { %1183 = vst.msk [vmem:[%s1890_s5 + $0x10] sm:$0xf] %vm1178_vm4, %v1509_v38  ;;  %1211 = vst.msk [vmem:[%s1890_s5 + $0x80] sm:$0xf] %vm1178_vm4, %v1537_v39  ;;  %v913_v44 = vmax.f32 %v859_v40, 0.0  ;;  %v941_v45 = vmax.f32 %v887_v41, 0.0  ;;  %v799_v46 = vmul.f32 %v2013_v34, %v595_v42  ;;  %v827_v47 = vmul.f32 %v2013_v34, %v707_v43 }
  0xfb   : > { %v1606_v48 = vpop.f32.mrf.mxu0  ;;  %v1662_v49 = vpop.f32.mrf.mxu1 }
  0xfc   : > { %v1510_v50 = vpack.c.bf16 %v913_v44, %v913_v44  ;;  %v1538_v51 = vpack.c.bf16 %v941_v45, %v941_v45  ;;  %v860_v52 = vadd.f32 %v2018_v36, %v799_v46  ;;  %v888_v53 = vadd.f32 %v2018_v36, %v827_v47 }
  0xfd   : > { %v598_v54 = vpop.f32.mrf.mxu0  ;;  %v710_v55 = vpop.f32.mrf.mxu1 }
  0xfe   : > { %1184 = vst.msk [vmem:[%s1890_s5 + $0x14] sm:$0xf] %vm1178_vm4, %v1510_v50  ;;  %1212 = vst.msk [vmem:[%s1890_s5 + $0x84] sm:$0xf] %vm1178_vm4, %v1538_v51  ;;  %v914_v56 = vmax.f32 %v860_v52, 0.0  ;;  %v942_v57 = vmax.f32 %v888_v53, 0.0  ;;  %v800_v58 = vmul.f32 %v2013_v34, %v598_v54  ;;  %v828_v59 = vmul.f32 %v2013_v34, %v710_v55 }
  0xff   : > { %v1607_v60 = vpop.f32.mrf.mxu0  ;;  %v1663_v61 = vpop.f32.mrf.mxu1 }
 0x100   : > { %v1511_v62 = vpack.c.bf16 %v914_v56, %v914_v56  ;;  %v1539_v63 = vpack.c.bf16 %v942_v57, %v942_v57  ;;  %v861_v0 = vadd.f32 %v2018_v36, %v800_v58  ;;  %v889_v1 = vadd.f32 %v2018_v36, %v828_v59 }
 0x101   : > { %v603_v2 = vpop.f32.mrf.mxu0  ;;  %v715_v3 = vpop.f32.mrf.mxu1 }
 0x102   : > { %1185 = vst.msk [vmem:[%s1890_s5 + $0x18] sm:$0xf] %vm1178_vm4, %v1511_v62  ;;  %1213 = vst.msk [vmem:[%s1890_s5 + $0x88] sm:$0xf] %vm1178_vm4, %v1539_v63  ;;  %v915_v4 = vmax.f32 %v861_v0, 0.0  ;;  %v943_v5 = vmax.f32 %v889_v1, 0.0  ;;  %v801_v6 = vmul.f32 %v2013_v34, %v603_v2  ;;  %v829_v7 = vmul.f32 %v2013_v34, %v715_v3 }
 0x103   : > { %v1610_v8 = vpop.f32.mrf.mxu0  ;;  %v1666_v9 = vpop.f32.mrf.mxu1 }
 0x104   : > { %v1512_v10 = vpack.c.bf16 %v915_v4, %v915_v4  ;;  %v1540_v11 = vpack.c.bf16 %v943_v5, %v943_v5  ;;  %v862_v12 = vadd.f32 %v2018_v36, %v801_v6  ;;  %v890_v13 = vadd.f32 %v2018_v36, %v829_v7 }
 0x105   : > { %v606_v14 = vpop.f32.mrf.mxu0  ;;  %v718_v15 = vpop.f32.mrf.mxu1 }
 0x106   : > { %1186 = vst.msk [vmem:[%s1890_s5 + $0x1c] sm:$0xf] %vm1178_vm4, %v1512_v10  ;;  %1214 = vst.msk [vmem:[%s1890_s5 + $0x8c] sm:$0xf] %vm1178_vm4, %v1540_v11  ;;  %v916_v16 = vmax.f32 %v862_v12, 0.0  ;;  %v944_v17 = vmax.f32 %v890_v13, 0.0  ;;  %v802_v18 = vmul.f32 %v2013_v34, %v606_v14  ;;  %v830_v19 = vmul.f32 %v2013_v34, %v718_v15 }
 0x107   : > { %v1611_v20 = vpop.f32.mrf.mxu0  ;;  %v1667_v21 = vpop.f32.mrf.mxu1 }
 0x108   : > { %v1513_v22 = vpack.c.bf16 %v916_v16, %v916_v16  ;;  %v1541_v23 = vpack.c.bf16 %v944_v17, %v944_v17  ;;  %v863_v24 = vadd.f32 %v2018_v36, %v802_v18  ;;  %v891_v25 = vadd.f32 %v2018_v36, %v830_v19 }
 0x109   : > { %v611_v26 = vpop.f32.mrf.mxu0  ;;  %v723_v27 = vpop.f32.mrf.mxu1 }
 0x10a   : > { %1187 = vst.msk [vmem:[%s1890_s5 + $0x20] sm:$0xf] %vm1178_vm4, %v1513_v22  ;;  %1215 = vst.msk [vmem:[%s1890_s5 + $0x90] sm:$0xf] %vm1178_vm4, %v1541_v23  ;;  %v917_v28 = vmax.f32 %v863_v24, 0.0  ;;  %v945_v29 = vmax.f32 %v891_v25, 0.0  ;;  %v803_v30 = vmul.f32 %v2013_v34, %v611_v26  ;;  %v831_v31 = vmul.f32 %v2013_v34, %v723_v27 }
 0x10b   : > { %v1614_v32 = vpop.f32.mrf.mxu0  ;;  %v1670_v33 = vpop.f32.mrf.mxu1 }
 0x10c   : > { %v1514_v35 = vpack.c.bf16 %v917_v28, %v917_v28  ;;  %v1542_v37 = vpack.c.bf16 %v945_v29, %v945_v29  ;;  %v864_v38 = vadd.f32 %v2018_v36, %v803_v30  ;;  %v892_v39 = vadd.f32 %v2018_v36, %v831_v31 }
 0x10d   : > { %v614_v40 = vpop.f32.mrf.mxu0  ;;  %v726_v41 = vpop.f32.mrf.mxu1 }
 0x10e   : > { %1188 = vst.msk [vmem:[%s1890_s5 + $0x24] sm:$0xf] %vm1178_vm4, %v1514_v35  ;;  %1216 = vst.msk [vmem:[%s1890_s5 + $0x94] sm:$0xf] %vm1178_vm4, %v1542_v37  ;;  %v918_v42 = vmax.f32 %v864_v38, 0.0  ;;  %v946_v43 = vmax.f32 %v892_v39, 0.0  ;;  %v804_v44 = vmul.f32 %v2013_v34, %v614_v40  ;;  %v832_v45 = vmul.f32 %v2013_v34, %v726_v41 }
 0x10f   : > { %v1615_v46 = vpop.f32.mrf.mxu0  ;;  %v1671_v47 = vpop.f32.mrf.mxu1 }
 0x110   : > { %v1515_v48 = vpack.c.bf16 %v918_v42, %v918_v42  ;;  %v1543_v49 = vpack.c.bf16 %v946_v43, %v946_v43  ;;  %v865_v50 = vadd.f32 %v2018_v36, %v804_v44  ;;  %v893_v51 = vadd.f32 %v2018_v36, %v832_v45 }
 0x111   : > { %v619_v52 = vpop.f32.mrf.mxu0  ;;  %v731_v53 = vpop.f32.mrf.mxu1 }
 0x112   : > { %1189 = vst.msk [vmem:[%s1890_s5 + $0x28] sm:$0xf] %vm1178_vm4, %v1515_v48  ;;  %1217 = vst.msk [vmem:[%s1890_s5 + $0x98] sm:$0xf] %vm1178_vm4, %v1543_v49  ;;  %v919_v54 = vmax.f32 %v865_v50, 0.0  ;;  %v947_v55 = vmax.f32 %v893_v51, 0.0  ;;  %v805_v56 = vmul.f32 %v2013_v34, %v619_v52  ;;  %v833_v57 = vmul.f32 %v2013_v34, %v731_v53 }
 0x113   : > { %v1618_v58 = vpop.f32.mrf.mxu0  ;;  %v1674_v59 = vpop.f32.mrf.mxu1 }
 0x114   : > { %v1516_v60 = vpack.c.bf16 %v919_v54, %v919_v54  ;;  %v1544_v61 = vpack.c.bf16 %v947_v55, %v947_v55  ;;  %v866_v62 = vadd.f32 %v2018_v36, %v805_v56  ;;  %v894_v63 = vadd.f32 %v2018_v36, %v833_v57 }
 0x115   : > { %v622_v0 = vpop.f32.mrf.mxu0  ;;  %v734_v1 = vpop.f32.mrf.mxu1 }
 0x116   : > { %1190 = vst.msk [vmem:[%s1890_s5 + $0x2c] sm:$0xf] %vm1178_vm4, %v1516_v60  ;;  %1218 = vst.msk [vmem:[%s1890_s5 + $0x9c] sm:$0xf] %vm1178_vm4, %v1544_v61  ;;  %v920_v2 = vmax.f32 %v866_v62, 0.0  ;;  %v948_v3 = vmax.f32 %v894_v63, 0.0  ;;  %v806_v4 = vmul.f32 %v2013_v34, %v622_v0  ;;  %v834_v5 = vmul.f32 %v2013_v34, %v734_v1 }
 0x117   : > { %v1619_v6 = vpop.f32.mrf.mxu0  ;;  %v1675_v7 = vpop.f32.mrf.mxu1 }
 0x118   : > { %v1517_v8 = vpack.c.bf16 %v920_v2, %v920_v2  ;;  %v1545_v9 = vpack.c.bf16 %v948_v3, %v948_v3  ;;  %v867_v10 = vadd.f32 %v2018_v36, %v806_v4  ;;  %v895_v11 = vadd.f32 %v2018_v36, %v834_v5 }
 0x119   : > { %v627_v12 = vpop.f32.mrf.mxu0  ;;  %v739_v13 = vpop.f32.mrf.mxu1 }
 0x11a   : > { %1191 = vst.msk [vmem:[%s1890_s5 + $0x30] sm:$0xf] %vm1178_vm4, %v1517_v8  ;;  %1219 = vst.msk [vmem:[%s1890_s5 + $0xa0] sm:$0xf] %vm1178_vm4, %v1545_v9  ;;  %v921_v14 = vmax.f32 %v867_v10, 0.0  ;;  %v949_v15 = vmax.f32 %v895_v11, 0.0  ;;  %v807_v16 = vmul.f32 %v2013_v34, %v627_v12  ;;  %v835_v17 = vmul.f32 %v2013_v34, %v739_v13 }
 0x11b   : > { %v1622_v18 = vpop.f32.mrf.mxu0  ;;  %v1678_v19 = vpop.f32.mrf.mxu1 }
 0x11c   : > { %v1518_v20 = vpack.c.bf16 %v921_v14, %v921_v14  ;;  %v1546_v21 = vpack.c.bf16 %v949_v15, %v949_v15  ;;  %v868_v22 = vadd.f32 %v2018_v36, %v807_v16  ;;  %v896_v23 = vadd.f32 %v2018_v36, %v835_v17 }
 0x11d   : > { %v630_v24 = vpop.f32.mrf.mxu0  ;;  %v742_v25 = vpop.f32.mrf.mxu1 }
 0x11e   : > { %1192 = vst.msk [vmem:[%s1890_s5 + $0x34] sm:$0xf] %vm1178_vm4, %v1518_v20  ;;  %1220 = vst.msk [vmem:[%s1890_s5 + $0xa4] sm:$0xf] %vm1178_vm4, %v1546_v21  ;;  %v922_v26 = vmax.f32 %v868_v22, 0.0  ;;  %v950_v27 = vmax.f32 %v896_v23, 0.0  ;;  %v808_v28 = vmul.f32 %v2013_v34, %v630_v24  ;;  %v836_v29 = vmul.f32 %v2013_v34, %v742_v25 }
 0x11f   : > { %v1623_v30 = vpop.f32.mrf.mxu0  ;;  %v1679_v31 = vpop.f32.mrf.mxu1 }
 0x120   : > { %v1519_v32 = vpack.c.bf16 %v922_v26, %v922_v26  ;;  %v1547_v33 = vpack.c.bf16 %v950_v27, %v950_v27  ;;  %v869_v35 = vadd.f32 %v2018_v36, %v808_v28  ;;  %v897_v37 = vadd.f32 %v2018_v36, %v836_v29 }
 0x121   : > { %v635_v38 = vpop.f32.mrf.mxu0  ;;  %v747_v39 = vpop.f32.mrf.mxu1 }
 0x122   : > { %1193 = vst.msk [vmem:[%s1890_s5 + $0x38] sm:$0xf] %vm1178_vm4, %v1519_v32  ;;  %1221 = vst.msk [vmem:[%s1890_s5 + $0xa8] sm:$0xf] %vm1178_vm4, %v1547_v33  ;;  %v923_v40 = vmax.f32 %v869_v35, 0.0  ;;  %v951_v41 = vmax.f32 %v897_v37, 0.0  ;;  %v809_v42 = vmul.f32 %v2013_v34, %v635_v38  ;;  %v837_v43 = vmul.f32 %v2013_v34, %v747_v39 }
 0x123   : > { %v1626_v44 = vpop.f32.mrf.mxu0  ;;  %v1682_v45 = vpop.f32.mrf.mxu1 }
 0x124   : > { %v1520_v46 = vpack.c.bf16 %v923_v40, %v923_v40  ;;  %v1548_v47 = vpack.c.bf16 %v951_v41, %v951_v41  ;;  %v870_v48 = vadd.f32 %v2018_v36, %v809_v42  ;;  %v898_v49 = vadd.f32 %v2018_v36, %v837_v43 }
 0x125   : > { %v638_v50 = vpop.f32.mrf.mxu0  ;;  %v750_v51 = vpop.f32.mrf.mxu1 }
 0x126   : > { %1194 = vst.msk [vmem:[%s1890_s5 + $0x3c] sm:$0xf] %vm1178_vm4, %v1520_v46  ;;  %1222 = vst.msk [vmem:[%s1890_s5 + $0xac] sm:$0xf] %vm1178_vm4, %v1548_v47  ;;  %v924_v52 = vmax.f32 %v870_v48, 0.0  ;;  %v952_v53 = vmax.f32 %v898_v49, 0.0  ;;  %v810_v54 = vmul.f32 %v2013_v34, %v638_v50  ;;  %v838_v55 = vmul.f32 %v2013_v34, %v750_v51 }
 0x127   : > { %v1627_v56 = vpop.f32.mrf.mxu0  ;;  %v1683_v57 = vpop.f32.mrf.mxu1 }
 0x128   : > { %v1521_v58 = vpack.c.bf16 %v924_v52, %v924_v52  ;;  %v1549_v59 = vpack.c.bf16 %v952_v53, %v952_v53  ;;  %v871_v60 = vadd.f32 %v2018_v36, %v810_v54  ;;  %v899_v61 = vadd.f32 %v2018_v36, %v838_v55 }
 0x129   : > { %v643_v62 = vpop.f32.mrf.mxu0  ;;  %v755_v63 = vpop.f32.mrf.mxu1 }
 0x12a   : > { %1195 = vst.msk [vmem:[%s1890_s5 + $0x40] sm:$0xf] %vm1178_vm4, %v1521_v58  ;;  %1223 = vst.msk [vmem:[%s1890_s5 + $0xb0] sm:$0xf] %vm1178_vm4, %v1549_v59  ;;  %v925_v0 = vmax.f32 %v871_v60, 0.0  ;;  %v953_v1 = vmax.f32 %v899_v61, 0.0  ;;  %v811_v2 = vmul.f32 %v2013_v34, %v643_v62  ;;  %v839_v3 = vmul.f32 %v2013_v34, %v755_v63 }
 0x12b   : > { %v1630_v4 = vpop.f32.mrf.mxu0  ;;  %v1686_v5 = vpop.f32.mrf.mxu1 }
 0x12c   : > { %v1522_v6 = vpack.c.bf16 %v925_v0, %v925_v0  ;;  %v1550_v7 = vpack.c.bf16 %v953_v1, %v953_v1  ;;  %v872_v8 = vadd.f32 %v2018_v36, %v811_v2  ;;  %v900_v9 = vadd.f32 %v2018_v36, %v839_v3 }
 0x12d   : > { %v646_v10 = vpop.f32.mrf.mxu0  ;;  %v758_v11 = vpop.f32.mrf.mxu1 }
 0x12e   : > { %1196 = vst.msk [vmem:[%s1890_s5 + $0x44] sm:$0xf] %vm1178_vm4, %v1522_v6  ;;  %1224 = vst.msk [vmem:[%s1890_s5 + $0xb4] sm:$0xf] %vm1178_vm4, %v1550_v7  ;;  %v926_v12 = vmax.f32 %v872_v8, 0.0  ;;  %v954_v13 = vmax.f32 %v900_v9, 0.0  ;;  %v812_v14 = vmul.f32 %v2013_v34, %v646_v10  ;;  %v840_v15 = vmul.f32 %v2013_v34, %v758_v11 }
 0x12f   : > { %v1631_v16 = vpop.f32.mrf.mxu0  ;;  %v1687_v17 = vpop.f32.mrf.mxu1 }
 0x130   : > { %v1523_v18 = vpack.c.bf16 %v926_v12, %v926_v12  ;;  %v1551_v19 = vpack.c.bf16 %v954_v13, %v954_v13  ;;  %v873_v20 = vadd.f32 %v2018_v36, %v812_v14  ;;  %v901_v21 = vadd.f32 %v2018_v36, %v840_v15 }
 0x131   : > { %v651_v22 = vpop.f32.mrf.mxu0  ;;  %v763_v23 = vpop.f32.mrf.mxu1 }
 0x132   : > { %1197 = vst.msk [vmem:[%s1890_s5 + $0x48] sm:$0xf] %vm1178_vm4, %v1523_v18  ;;  %1225 = vst.msk [vmem:[%s1890_s5 + $0xb8] sm:$0xf] %vm1178_vm4, %v1551_v19  ;;  %v927_v24 = vmax.f32 %v873_v20, 0.0  ;;  %v955_v25 = vmax.f32 %v901_v21, 0.0  ;;  %v813_v26 = vmul.f32 %v2013_v34, %v651_v22  ;;  %v841_v27 = vmul.f32 %v2013_v34, %v763_v23 }
 0x133   : > { %v1634_v28 = vpop.f32.mrf.mxu0  ;;  %v1690_v29 = vpop.f32.mrf.mxu1 }
 0x134   : > { %v1524_v30 = vpack.c.bf16 %v927_v24, %v927_v24  ;;  %v1552_v31 = vpack.c.bf16 %v955_v25, %v955_v25  ;;  %v874_v32 = vadd.f32 %v2018_v36, %v813_v26  ;;  %v902_v33 = vadd.f32 %v2018_v36, %v841_v27 }
 0x135   : > { %v654_v35 = vpop.f32.mrf.mxu0  ;;  %v766_v37 = vpop.f32.mrf.mxu1 }
 0x136   : > { %1198 = vst.msk [vmem:[%s1890_s5 + $0x4c] sm:$0xf] %vm1178_vm4, %v1524_v30  ;;  %1226 = vst.msk [vmem:[%s1890_s5 + $0xbc] sm:$0xf] %vm1178_vm4, %v1552_v31  ;;  %v928_v38 = vmax.f32 %v874_v32, 0.0  ;;  %v956_v39 = vmax.f32 %v902_v33, 0.0  ;;  %v814_v40 = vmul.f32 %v2013_v34, %v654_v35  ;;  %v842_v41 = vmul.f32 %v2013_v34, %v766_v37 }
 0x137   : > { %v1635_v42 = vpop.f32.mrf.mxu0  ;;  %v1691_v43 = vpop.f32.mrf.mxu1 }
 0x138   : > { %v1525_v44 = vpack.c.bf16 %v928_v38, %v928_v38  ;;  %v1553_v45 = vpack.c.bf16 %v956_v39, %v956_v39  ;;  %v875_v46 = vadd.f32 %v2018_v36, %v814_v40  ;;  %v903_v47 = vadd.f32 %v2018_v36, %v842_v41 }
 0x139   : > { %v659_v48 = vpop.f32.mrf.mxu0  ;;  %v771_v49 = vpop.f32.mrf.mxu1 }
 0x13a   : > { %1199 = vst.msk [vmem:[%s1890_s5 + $0x50] sm:$0xf] %vm1178_vm4, %v1525_v44  ;;  %1227 = vst.msk [vmem:[%s1890_s5 + $0xc0] sm:$0xf] %vm1178_vm4, %v1553_v45  ;;  %v929_v50 = vmax.f32 %v875_v46, 0.0  ;;  %v957_v51 = vmax.f32 %v903_v47, 0.0  ;;  %v815_v52 = vmul.f32 %v2013_v34, %v659_v48  ;;  %v843_v53 = vmul.f32 %v2013_v34, %v771_v49 }
 0x13b   : > { %v1638_v54 = vpop.f32.mrf.mxu0  ;;  %v1694_v55 = vpop.f32.mrf.mxu1 }
 0x13c   : > { %v1526_v56 = vpack.c.bf16 %v929_v50, %v929_v50  ;;  %v1554_v57 = vpack.c.bf16 %v957_v51, %v957_v51  ;;  %v876_v58 = vadd.f32 %v2018_v36, %v815_v52  ;;  %v904_v59 = vadd.f32 %v2018_v36, %v843_v53 }
 0x13d   : > { %v662_v60 = vpop.f32.mrf.mxu0  ;;  %v774_v61 = vpop.f32.mrf.mxu1 }
 0x13e   : > { %1200 = vst.msk [vmem:[%s1890_s5 + $0x54] sm:$0xf] %vm1178_vm4, %v1526_v56  ;;  %1228 = vst.msk [vmem:[%s1890_s5 + $0xc4] sm:$0xf] %vm1178_vm4, %v1554_v57  ;;  %v930_v62 = vmax.f32 %v876_v58, 0.0  ;;  %v958_v63 = vmax.f32 %v904_v59, 0.0  ;;  %v816_v0 = vmul.f32 %v2013_v34, %v662_v60  ;;  %v844_v1 = vmul.f32 %v2013_v34, %v774_v61 }
 0x13f   : > { %v1639_v2 = vpop.f32.mrf.mxu0  ;;  %v1695_v3 = vpop.f32.mrf.mxu1 }
 0x140   : > { %v1527_v4 = vpack.c.bf16 %v930_v62, %v930_v62  ;;  %v1555_v5 = vpack.c.bf16 %v958_v63, %v958_v63  ;;  %v877_v6 = vadd.f32 %v2018_v36, %v816_v0  ;;  %v905_v7 = vadd.f32 %v2018_v36, %v844_v1 }
 0x141   : > { %v667_v8 = vpop.f32.mrf.mxu0  ;;  %v779_v9 = vpop.f32.mrf.mxu1 }
 0x142   : > { %1201 = vst.msk [vmem:[%s1890_s5 + $0x58] sm:$0xf] %vm1178_vm4, %v1527_v4  ;;  %1229 = vst.msk [vmem:[%s1890_s5 + $0xc8] sm:$0xf] %vm1178_vm4, %v1555_v5  ;;  %v931_v10 = vmax.f32 %v877_v6, 0.0  ;;  %v959_v11 = vmax.f32 %v905_v7, 0.0  ;;  %v817_v12 = vmul.f32 %v2013_v34, %v667_v8  ;;  %v845_v13 = vmul.f32 %v2013_v34, %v779_v9 }
 0x143   : > { %v1642_v14 = vpop.f32.mrf.mxu0  ;;  %v1698_v15 = vpop.f32.mrf.mxu1 }
 0x144   : > { %v1528_v16 = vpack.c.bf16 %v931_v10, %v931_v10  ;;  %v1556_v17 = vpack.c.bf16 %v959_v11, %v959_v11  ;;  %v878_v18 = vadd.f32 %v2018_v36, %v817_v12  ;;  %v906_v19 = vadd.f32 %v2018_v36, %v845_v13 }
 0x145   : > { %v670_v20 = vpop.f32.mrf.mxu0  ;;  %v782_v21 = vpop.f32.mrf.mxu1 }
 0x146   : > { %1202 = vst.msk [vmem:[%s1890_s5 + $0x5c] sm:$0xf] %vm1178_vm4, %v1528_v16  ;;  %1230 = vst.msk [vmem:[%s1890_s5 + $0xcc] sm:$0xf] %vm1178_vm4, %v1556_v17  ;;  %v932_v22 = vmax.f32 %v878_v18, 0.0  ;;  %v960_v23 = vmax.f32 %v906_v19, 0.0  ;;  %v818_v24 = vmul.f32 %v2013_v34, %v670_v20  ;;  %v846_v25 = vmul.f32 %v2013_v34, %v782_v21 }
 0x147   : > { %v1643_v26 = vpop.f32.mrf.mxu0  ;;  %v1699_v27 = vpop.f32.mrf.mxu1 }
 0x148   : > { %v1529_v28 = vpack.c.bf16 %v932_v22, %v932_v22  ;;  %v1557_v29 = vpack.c.bf16 %v960_v23, %v960_v23  ;;  %v879_v30 = vadd.f32 %v2018_v36, %v818_v24  ;;  %v907_v31 = vadd.f32 %v2018_v36, %v846_v25 }
 0x149   : > { %v675_v32 = vpop.f32.mrf.mxu0 }
 0x14a   : > { %1203 = vst.msk [vmem:[%s1890_s5 + $0x60] sm:$0xf] %vm1178_vm4, %v1529_v28  ;;  %1231 = vst.msk [vmem:[%s1890_s5 + $0xd0] sm:$0xf] %vm1178_vm4, %v1557_v29  ;;  %v933_v33 = vmax.f32 %v879_v30, 0.0  ;;  %v961_v35 = vmax.f32 %v907_v31, 0.0  ;;  %v819_v37 = vmul.f32 %v2013_v34, %v675_v32 }
 0x14b   : > { %v1646_v38 = vpop.f32.mrf.mxu0 }
 0x14c   : > { %v1530_v39 = vpack.c.bf16 %v933_v33, %v933_v33  ;;  %v1558_v40 = vpack.c.bf16 %v961_v35, %v961_v35  ;;  %v880_v41 = vadd.f32 %v2018_v36, %v819_v37 }
 0x14d   : > { %v678_v42 = vpop.f32.mrf.mxu0 }
 0x14e   : > { %1204 = vst.msk [vmem:[%s1890_s5 + $0x64] sm:$0xf] %vm1178_vm4, %v1530_v39  ;;  %1232 = vst.msk [vmem:[%s1890_s5 + $0xd4] sm:$0xf] %vm1178_vm4, %v1558_v40  ;;  %v934_v43 = vmax.f32 %v880_v41, 0.0  ;;  %v820_v44 = vmul.f32 %v2013_v34, %v678_v42 }
 0x14f   : > { %v1647_v45 = vpop.f32.mrf.mxu0 }
 0x150   : > { %v1531_v46 = vpack.c.bf16 %v934_v43, %v934_v43  ;;  %v881_v47 = vadd.f32 %v2018_v36, %v820_v44 }
 0x152   : > { %1205 = vst.msk [vmem:[%s1890_s5 + $0x68] sm:$0xf] %vm1178_vm4, %v1531_v46  ;;  %v935_v48 = vmax.f32 %v881_v47, 0.0 }
 0x154   : > { %v1532_v49 = vpack.c.bf16 %v935_v48, %v935_v48 }
 0x156   : > { %1206 = vst.msk [vmem:[%s1890_s5 + $0x6c] sm:$0xf] %vm1178_vm4, %v1532_v49 }
 0x157 PF: > { %p1233_p10 = scmp.eq.s32.totalorder %s1800_s15, 0  ;;  %p1234_p11 = scmp.eq.s32.totalorder %s1800_s15, 2 }
 0x159   : > { %p1235_p12 = por %p1234_p11, %p1233_p10 }
 0x15a   : > { %vm1239_vm5 = vcmask (%p1235_p12), 257024   ;;  %v1821_v34 = vmov (%p1235_p12), 0  }
 0x15b   : > { %1238 = sbr.rel (!%p1235_p12) target bundleno = 374 (0x176), region = 44  ;;  %1240 = vst.msk [vmem:[%s1890_s5] sm:$0xf] (%p1235_p12), %vm1239_vm5, %v1821_v34  ;;  %1241 = vst.msk [vmem:[%s1890_s5 + $0x4] sm:$0xf] (%p1235_p12), %vm1239_vm5, %v1821_v34 }
 0x15c   : > { %1242 = vst.msk [vmem:[%s1890_s5 + $0x8] sm:$0xf] (%p1235_p12), %vm1239_vm5, %v1821_v34  ;;  %1243 = vst.msk [vmem:[%s1890_s5 + $0xc] sm:$0xf] (%p1235_p12), %vm1239_vm5, %v1821_v34 }
 0x15d   : > { %1244 = vst.msk [vmem:[%s1890_s5 + $0x10] sm:$0xf] (%p1235_p12), %vm1239_vm5, %v1821_v34  ;;  %1245 = vst.msk [vmem:[%s1890_s5 + $0x14] sm:$0xf] (%p1235_p12), %vm1239_vm5, %v1821_v34 }
 0x15e   : > { %1246 = vst.msk [vmem:[%s1890_s5 + $0x18] sm:$0xf] (%p1235_p12), %vm1239_vm5, %v1821_v34  ;;  %1247 = vst.msk [vmem:[%s1890_s5 + $0x1c] sm:$0xf] (%p1235_p12), %vm1239_vm5, %v1821_v34 }
 0x15f   : > { %1248 = vst.msk [vmem:[%s1890_s5 + $0x20] sm:$0xf] (%p1235_p12), %vm1239_vm5, %v1821_v34  ;;  %1249 = vst.msk [vmem:[%s1890_s5 + $0x24] sm:$0xf] (%p1235_p12), %vm1239_vm5, %v1821_v34 }
 0x160   : > { %1250 = vst.msk [vmem:[%s1890_s5 + $0x28] sm:$0xf] %vm1239_vm5, %v1821_v34  ;;  %1251 = vst.msk [vmem:[%s1890_s5 + $0x2c] sm:$0xf] %vm1239_vm5, %v1821_v34 }
 0x161   : > { %1252 = vst.msk [vmem:[%s1890_s5 + $0x30] sm:$0xf] %vm1239_vm5, %v1821_v34  ;;  %1253 = vst.msk [vmem:[%s1890_s5 + $0x34] sm:$0xf] %vm1239_vm5, %v1821_v34 }
 0x162   : > { %1254 = vst.msk [vmem:[%s1890_s5 + $0x38] sm:$0xf] %vm1239_vm5, %v1821_v34  ;;  %1255 = vst.msk [vmem:[%s1890_s5 + $0x3c] sm:$0xf] %vm1239_vm5, %v1821_v34 }
 0x163   : > { %1256 = vst.msk [vmem:[%s1890_s5 + $0x40] sm:$0xf] %vm1239_vm5, %v1821_v34  ;;  %1257 = vst.msk [vmem:[%s1890_s5 + $0x44] sm:$0xf] %vm1239_vm5, %v1821_v34 }
 0x164   : > { %1258 = vst.msk [vmem:[%s1890_s5 + $0x48] sm:$0xf] %vm1239_vm5, %v1821_v34  ;;  %1259 = vst.msk [vmem:[%s1890_s5 + $0x4c] sm:$0xf] %vm1239_vm5, %v1821_v34 }
 0x165   : > { %1260 = vst.msk [vmem:[%s1890_s5 + $0x50] sm:$0xf] %vm1239_vm5, %v1821_v34  ;;  %1261 = vst.msk [vmem:[%s1890_s5 + $0x54] sm:$0xf] %vm1239_vm5, %v1821_v34 }
 0x166   : > { %1262 = vst.msk [vmem:[%s1890_s5 + $0x58] sm:$0xf] %vm1239_vm5, %v1821_v34  ;;  %1263 = vst.msk [vmem:[%s1890_s5 + $0x5c] sm:$0xf] %vm1239_vm5, %v1821_v34 }
 0x167   : > { %1264 = vst.msk [vmem:[%s1890_s5 + $0x60] sm:$0xf] %vm1239_vm5, %v1821_v34  ;;  %1265 = vst.msk [vmem:[%s1890_s5 + $0x64] sm:$0xf] %vm1239_vm5, %v1821_v34 }
 0x168   : > { %1266 = vst.msk [vmem:[%s1890_s5 + $0x68] sm:$0xf] %vm1239_vm5, %v1821_v34  ;;  %1267 = vst.msk [vmem:[%s1890_s5 + $0x6c] sm:$0xf] %vm1239_vm5, %v1821_v34 }
 0x169   : > { %1268 = vst.msk [vmem:[%s1890_s5 + $0x70] sm:$0xf] %vm1239_vm5, %v1821_v34  ;;  %1269 = vst.msk [vmem:[%s1890_s5 + $0x74] sm:$0xf] %vm1239_vm5, %v1821_v34 }
 0x16a   : > { %1270 = vst.msk [vmem:[%s1890_s5 + $0x78] sm:$0xf] %vm1239_vm5, %v1821_v34  ;;  %1271 = vst.msk [vmem:[%s1890_s5 + $0x7c] sm:$0xf] %vm1239_vm5, %v1821_v34 }
 0x16b   : > { %1272 = vst.msk [vmem:[%s1890_s5 + $0x80] sm:$0xf] %vm1239_vm5, %v1821_v34  ;;  %1273 = vst.msk [vmem:[%s1890_s5 + $0x84] sm:$0xf] %vm1239_vm5, %v1821_v34 }
 0x16c   : > { %1274 = vst.msk [vmem:[%s1890_s5 + $0x88] sm:$0xf] %vm1239_vm5, %v1821_v34  ;;  %1275 = vst.msk [vmem:[%s1890_s5 + $0x8c] sm:$0xf] %vm1239_vm5, %v1821_v34 }
 0x16d   : > { %1276 = vst.msk [vmem:[%s1890_s5 + $0x90] sm:$0xf] %vm1239_vm5, %v1821_v34  ;;  %1277 = vst.msk [vmem:[%s1890_s5 + $0x94] sm:$0xf] %vm1239_vm5, %v1821_v34 }
 0x16e   : > { %1278 = vst.msk [vmem:[%s1890_s5 + $0x98] sm:$0xf] %vm1239_vm5, %v1821_v34  ;;  %1279 = vst.msk [vmem:[%s1890_s5 + $0x9c] sm:$0xf] %vm1239_vm5, %v1821_v34 }
 0x16f   : > { %1280 = vst.msk [vmem:[%s1890_s5 + $0xa0] sm:$0xf] %vm1239_vm5, %v1821_v34  ;;  %1281 = vst.msk [vmem:[%s1890_s5 + $0xa4] sm:$0xf] %vm1239_vm5, %v1821_v34 }
 0x170   : > { %1282 = vst.msk [vmem:[%s1890_s5 + $0xa8] sm:$0xf] %vm1239_vm5, %v1821_v34  ;;  %1283 = vst.msk [vmem:[%s1890_s5 + $0xac] sm:$0xf] %vm1239_vm5, %v1821_v34 }
 0x171   : > { %1284 = vst.msk [vmem:[%s1890_s5 + $0xb0] sm:$0xf] %vm1239_vm5, %v1821_v34  ;;  %1285 = vst.msk [vmem:[%s1890_s5 + $0xb4] sm:$0xf] %vm1239_vm5, %v1821_v34 }
 0x172   : > { %1286 = vst.msk [vmem:[%s1890_s5 + $0xb8] sm:$0xf] %vm1239_vm5, %v1821_v34  ;;  %1287 = vst.msk [vmem:[%s1890_s5 + $0xbc] sm:$0xf] %vm1239_vm5, %v1821_v34 }
 0x173   : > { %1288 = vst.msk [vmem:[%s1890_s5 + $0xc0] sm:$0xf] %vm1239_vm5, %v1821_v34  ;;  %1289 = vst.msk [vmem:[%s1890_s5 + $0xc4] sm:$0xf] %vm1239_vm5, %v1821_v34 }
 0x174   : > { %1290 = vst.msk [vmem:[%s1890_s5 + $0xc8] sm:$0xf] %vm1239_vm5, %v1821_v34  ;;  %1291 = vst.msk [vmem:[%s1890_s5 + $0xcc] sm:$0xf] %vm1239_vm5, %v1821_v34 }
 0x175   : > { %1292 = vst.msk [vmem:[%s1890_s5 + $0xd0] sm:$0xf] %vm1239_vm5, %v1821_v34  ;;  %1293 = vst.msk [vmem:[%s1890_s5 + $0xd4] sm:$0xf] %vm1239_vm5, %v1821_v34 }
 0x176 PF: > { %s14_s19 = sadd.s32 1, %s1816_s19   ;;  %s2366_s15 = smov %s1808_s17 }
 0x177   : > { %p11_p13 = scmp.ge.s32.totalorder %s14_s19, 8   ;;  %s2367_s16 = smov %s1812_s18 }
 0x178   : > { %s2368_s17 = smov %s2371_s20  ;;  %s2369_s18 = smov %s2375_s21 }
 0x179   :  { %13 = sbr.rel (!%p11_p13) target bundleno = 3 (0x3), region = 74 }

</bundles_post_ra>
